<compile_context>
chip_gen: v7x
topology: tpu7x:2x2x1
jax: 0.10.0
libtpu: 0.0.40
codegen_flags: <defaults>
</compile_context>

<pallas_src>
import jax
import jax.numpy as jnp
from jax.experimental import pallas as pl
from jax.experimental.pallas import tpu as pltpu


def rpca_kernel(x_ref, w1_ref, b1_ref, w2_ref, b2_ref, out_ref):
    # Linear 0 (+ folded eval-mode BatchNorm) + ReLU.
    # x arrives as bf16; up-cast so both matmuls run in f32 (keeps the
    # BN-scaled W1 exact; MXU has plenty of headroom at these shapes).
    x = x_ref[...].astype(jnp.float32)
    h = jnp.dot(x, w1_ref[...], preferred_element_type=jnp.float32) + b1_ref[...]
    h = jnp.maximum(h, 0.0)

    # Linear 1 -> logits over the (unpadded) class dim.
    logits = jnp.dot(h, w2_ref[...],
                     preferred_element_type=jnp.float32) + b2_ref[...]

    # log_softmax over classes (dim=1).
    m = jnp.max(logits, axis=1, keepdims=True)
    z = logits - m
    lse = jnp.log(jnp.sum(jnp.exp(z), axis=1, keepdims=True))
    out_ref[...] = (z - lse).astype(out_ref.dtype)


def _round_up(x, m):
    return ((x + m - 1) // m) * m


def _num_tensorcores():
    # Best-effort TensorCore count per chip (v7x has 2). Never raises.
    try:
        return max(1, int(getattr(jax.devices()[0], "num_cores", 1) or 1))
    except Exception:
        return 1


def rpca_forward(x, params, *, batchnorm=True, eps=1e-5, tile_m=1024,
                 x_bf16=True, num_tensorcores=None):
    """x: (N, F) float32. Returns (N, C) float32 log-probabilities (eval)."""
    N, F = x.shape
    H = params["w1"].shape[1]
    C = params["w2"].shape[1]

    w1 = params["w1"].astype(jnp.float32)
    b1 = params["b1"].astype(jnp.float32)
    w2 = params["w2"].astype(jnp.float32)
    b2 = params["b2"].astype(jnp.float32)

    # Fold eval-mode BatchNorm into the first Linear (kept in f32):
    #   BN(x) = x*scale + shift,  scale = gamma*rsqrt(var+eps),
    #   shift = beta - mean*scale
    #   BN(x) @ W1 + b1 = x @ (scale[:,None]*W1) + (shift @ W1 + b1)
    if batchnorm:
        scale = params["bn_gamma"] * jax.lax.rsqrt(params["bn_var"] + eps)
        shift = params["bn_beta"] - params["bn_mean"] * scale
        b1 = b1 + shift @ w1          # uses original W1 (before scaling)
        w1 = scale[:, None] * w1

    # Row-tile selection. Align to 32 rows (bf16 packs 16 rows/vreg, f32 8);
    # big default tile amortizes the ~0.35us per-grid-step overhead.
    ROW_ALIGN = 32
    if num_tensorcores is None:
        num_tensorcores = _num_tensorcores()
    tile = min(max(tile_m, ROW_ALIGN), _round_up(N, ROW_ALIGN))
    tile = max(ROW_ALIGN, (tile // ROW_ALIGN) * ROW_ALIGN)
    grid_m = pl.cdiv(N, tile)
    # v7x megacore: with >=2 TCs and >1 grid step, nudge the step count to be
    # even so both cores get equal work. No forced split on 1-TC parts.
    if num_tensorcores >= 2 and grid_m > 1 and grid_m % 2 != 0:
        tile = max(ROW_ALIGN, _round_up(pl.cdiv(N, grid_m + 1), ROW_ALIGN))
        grid_m = pl.cdiv(N, tile)
    N_pad = grid_m * tile
    if N_pad != N:
        x = jnp.pad(x, ((0, N_pad - N), (0, 0)))

    # x streams as bf16 (dominant per-row input read halved); everything else
    # stays f32.
    x_in = x.astype(jnp.bfloat16) if x_bf16 else x.astype(jnp.float32)
    b1 = b1.reshape(1, H)
    b2 = b2.reshape(1, C)

    rows = lambda i: (i, 0)        # tiled over sample rows
    whole = lambda i: (0, 0)       # weights resident across tiles

    # NOTE: weights are a few KiB at these shapes; if F/H ever grow large,
    # mark the weight BlockSpecs pipeline_mode=pl.Buffered(1) and set
    # vmem_limit_bytes explicitly.
    out = pl.pallas_call(
        rpca_kernel,
        out_shape=jax.ShapeDtypeStruct((N_pad, C), jnp.float32),
        grid_spec=pltpu.PrefetchScalarGridSpec(
            num_scalar_prefetch=0,
            grid=(grid_m,),
            in_specs=[
                pl.BlockSpec((tile, F), rows),   # x (bf16)
                pl.BlockSpec((F, H), whole),     # W1 (BN folded, f32)
                pl.BlockSpec((1, H), whole),     # b1 (f32)
                pl.BlockSpec((H, C), whole),     # W2 (f32)
                pl.BlockSpec((1, C), whole),     # b2 (f32)
            ],
            out_specs=pl.BlockSpec((tile, C), rows),
        ),
        compiler_params=pltpu.CompilerParams(
            dimension_semantics=("parallel",)),
    )(x_in, w1, b1, w2, b2)

    return out if N_pad == N else out[:N]


def init_params(key, num_features, hidden_dim, num_classes):
    k1, k2, k3, k4, k5, k6 = jax.random.split(key, 6)
    lim1 = 1.0 / jnp.sqrt(num_features)
    lim2 = 1.0 / jnp.sqrt(hidden_dim)
    return {
        "bn_gamma": jnp.ones((num_features,), jnp.float32),
        "bn_beta": jnp.zeros((num_features,), jnp.float32),
        "bn_mean": jax.random.normal(k5, (num_features,), jnp.float32) * 0.1,
        "bn_var": jnp.abs(jax.random.normal(k6, (num_features,), jnp.float32)) + 1.0,
        "w1": jax.random.uniform(k1, (num_features, hidden_dim), jnp.float32, -lim1, lim1),
        "b1": jax.random.uniform(k2, (hidden_dim,), jnp.float32, -lim1, lim1),
        "w2": jax.random.uniform(k3, (hidden_dim, num_classes), jnp.float32, -lim2, lim2),
        "b2": jax.random.uniform(k4, (num_classes,), jnp.float32, -lim2, lim2),
    }


def reference_forward(x, params, *, batchnorm=True, eps=1e-5):
    if batchnorm:
        x = (x - params["bn_mean"]) / jnp.sqrt(params["bn_var"] + eps)
        x = x * params["bn_gamma"] + params["bn_beta"]
    h = jnp.maximum(
        jnp.dot(x, params["w1"], precision="highest") + params["b1"], 0.0)
    logits = jnp.dot(h, params["w2"], precision="highest") + params["b2"]
    return jax.nn.log_softmax(logits, axis=1)


if __name__ == "__main__":
    # N deliberately not a multiple of the 32-row alignment so the row-padding
    # path (and the trailing row slice) is exercised.
    N, num_features, hidden_dim, num_classes = 200, 32, 64, 16
    key = jax.random.PRNGKey(0)
    kx, kp = jax.random.split(key)

    x = jax.random.normal(kx, (N, num_features), jnp.float32)
    params = init_params(kp, num_features, hidden_dim, num_classes)

    out = rpca_forward(x, params, batchnorm=True)
    out = jax.block_until_ready(out)

    ref = reference_forward(x, params, batchnorm=True)
    assert out.shape == (N, num_classes)
    assert bool(jnp.all(jnp.isfinite(out)))
    err = float(jnp.max(jnp.abs(out - ref)))
    # Only remaining quantization is the bf16 x stream; weights / accum / output
    # are all f32, so the error is small.
    assert err < 1e-2, f"max abs error {err}"

    print("KERNEL_OK")
</pallas_src>

<mosaic_0001>
module attributes {stable_mosaic.version = 11 : i64} {
  func.func @rpca_kernel(%arg0: i32, %arg1: memref<224x32xbf16, #tpu.memory_space<vmem>>, %arg2: memref<32x64xf32, #tpu.memory_space<vmem>>, %arg3: memref<1x64xf32, #tpu.memory_space<vmem>>, %arg4: memref<64x16xf32, #tpu.memory_space<vmem>>, %arg5: memref<1x16xf32, #tpu.memory_space<vmem>>, %arg6: memref<224x16xf32, #tpu.memory_space<vmem>>) attributes {dimension_semantics = [#tpu.dimension_semantics<parallel>], iteration_bounds = array<i64: 1>, scalar_prefetch = 0 : i64, scratch_operands = 0 : i64, tpu.core_type = #tpu.core_type<tc>, window_params = [{transform_indices = @transform_0, window_bounds = array<i64: 224, 32>}, {pipeline_mode = #tpu.pipeline_mode<synchronous>, transform_indices = @transform_1, window_bounds = array<i64: 32, 64>}, {pipeline_mode = #tpu.pipeline_mode<synchronous>, transform_indices = @transform_2, window_bounds = array<i64: 1, 64>}, {pipeline_mode = #tpu.pipeline_mode<synchronous>, transform_indices = @transform_3, window_bounds = array<i64: 64, 16>}, {pipeline_mode = #tpu.pipeline_mode<synchronous>, transform_indices = @transform_4, window_bounds = array<i64: 1, 16>}, {transform_indices = @transform_5, window_bounds = array<i64: 224, 16>}]} {
    %c0 = arith.constant 0 : index
    %c0_0 = arith.constant 0 : index
    %0 = vector.load %arg1[%c0, %c0_0] : memref<224x32xbf16, #tpu.memory_space<vmem>>, vector<224x32xbf16>
    %1 = arith.extf %0 : vector<224x32xbf16> to vector<224x32xf32>
    %c0_1 = arith.constant 0 : index
    %c0_2 = arith.constant 0 : index
    %2 = vector.load %arg2[%c0_1, %c0_2] : memref<32x64xf32, #tpu.memory_space<vmem>>, vector<32x64xf32>
    %cst = arith.constant dense<0.000000e+00> : vector<224x64xf32>
    %3 = tpu.matmul %1, %2, %cst {dimension_numbers = #tpu.dot_dimension_numbers<[1], [0], [0], [1], [0, 0, 1, 1], [], []>} : vector<224x32xf32>, vector<32x64xf32>, vector<224x64xf32> -> vector<224x64xf32>
    %c0_3 = arith.constant 0 : index
    %c0_4 = arith.constant 0 : index
    %4 = vector.load %arg3[%c0_3, %c0_4] : memref<1x64xf32, #tpu.memory_space<vmem>>, vector<1x64xf32>
    %5 = vector.broadcast %4 : vector<1x64xf32> to vector<224x64xf32>
    %6 = arith.addf %3, %5 : vector<224x64xf32>
    %cst_5 = arith.constant 0.000000e+00 : f32
    %7 = vector.broadcast %cst_5 : f32 to vector<224x64xf32>
    %8 = arith.maximumf %6, %7 : vector<224x64xf32>
    %c0_6 = arith.constant 0 : index
    %c0_7 = arith.constant 0 : index
    %9 = vector.load %arg4[%c0_6, %c0_7] : memref<64x16xf32, #tpu.memory_space<vmem>>, vector<64x16xf32>
    %cst_8 = arith.constant dense<0.000000e+00> : vector<224x16xf32>
    %10 = tpu.matmul %8, %9, %cst_8 {dimension_numbers = #tpu.dot_dimension_numbers<[1], [0], [0], [1], [0, 0, 1, 1], [], []>} : vector<224x64xf32>, vector<64x16xf32>, vector<224x16xf32> -> vector<224x16xf32>
    %c0_9 = arith.constant 0 : index
    %c0_10 = arith.constant 0 : index
    %11 = vector.load %arg5[%c0_9, %c0_10] : memref<1x16xf32, #tpu.memory_space<vmem>>, vector<1x16xf32>
    %12 = vector.broadcast %11 : vector<1x16xf32> to vector<224x16xf32>
    %13 = arith.addf %10, %12 : vector<224x16xf32>
    %cst_11 = arith.constant dense<0xFF800000> : vector<224xf32>
    %14 = vector.multi_reduction <maximumf>, %13, %cst_11 [1] : vector<224x16xf32> to vector<224xf32>
    %15 = vector.shape_cast %14 : vector<224xf32> to vector<224x1xf32>
    %16 = vector.broadcast %15 : vector<224x1xf32> to vector<224x16xf32>
    %17 = arith.subf %13, %16 : vector<224x16xf32>
    %18 = math.exp %17 : vector<224x16xf32>
    %cst_12 = arith.constant dense<0.000000e+00> : vector<224xf32>
    %19 = vector.multi_reduction <add>, %18, %cst_12 [1] : vector<224x16xf32> to vector<224xf32>
    %20 = vector.shape_cast %19 : vector<224xf32> to vector<224x1xf32>
    %21 = math.log %20 : vector<224x1xf32>
    %22 = vector.broadcast %21 : vector<224x1xf32> to vector<224x16xf32>
    %23 = arith.subf %17, %22 : vector<224x16xf32>
    %c0_13 = arith.constant 0 : index
    %c0_14 = arith.constant 0 : index
    %24 = vector.load %arg6[%c0_13, %c0_14] : memref<224x16xf32, #tpu.memory_space<vmem>>, vector<224x16xf32>
    tpu.vector_store %arg6[%c0_13, %c0_14], %23 {strides = array<i32>} : memref<224x16xf32, #tpu.memory_space<vmem>>, vector<224x16xf32>,
    return
  }
  func.func @transform_0(%arg0: i32) -> (i32, i32) {
    %c0_i32 = arith.constant 0 : i32
    %c0_i32_0 = arith.constant 0 : i32
    return %arg0, %c0_i32 : i32, i32
  }
  func.func @transform_1(%arg0: i32) -> (i32, i32) {
    %c0_i32 = arith.constant 0 : i32
    %c0_i32_0 = arith.constant 0 : i32
    %c0_i32_1 = arith.constant 0 : i32
    return %c0_i32, %c0_i32_0 : i32, i32
  }
  func.func @transform_2(%arg0: i32) -> (i32, i32) {
    %c0_i32 = arith.constant 0 : i32
    %c0_i32_0 = arith.constant 0 : i32
    %c0_i32_1 = arith.constant 0 : i32
    return %c0_i32, %c0_i32_0 : i32, i32
  }
  func.func @transform_3(%arg0: i32) -> (i32, i32) {
    %c0_i32 = arith.constant 0 : i32
    %c0_i32_0 = arith.constant 0 : i32
    %c0_i32_1 = arith.constant 0 : i32
    return %c0_i32, %c0_i32_0 : i32, i32
  }
  func.func @transform_4(%arg0: i32) -> (i32, i32) {
    %c0_i32 = arith.constant 0 : i32
    %c0_i32_0 = arith.constant 0 : i32
    %c0_i32_1 = arith.constant 0 : i32
    return %c0_i32, %c0_i32_0 : i32, i32
  }
  func.func @transform_5(%arg0: i32) -> (i32, i32) {
    %c0_i32 = arith.constant 0 : i32
    %c0_i32_0 = arith.constant 0 : i32
    return %arg0, %c0_i32 : i32, i32
  }
}

</mosaic_0001>

<bundles_post_ra>
// kernel: tpu_custom_call.1
= control target key start
LH: loop header
LB: loop body
LE: loop exit
PB: predicated region body
PF: predicated region fallthrough
CT: control target
= control target key end

     0   :  { %vm87_vm0 = vcmask 261120   ;;  %vm420_vm1 = vcmask 523264   ;;  %vm710_vm2 = vcmask 130048   ;;  %s2148_s1 = inlined_call_operand.vmem [shape: f32[32,64], index: 1, kind: input, shape index: {}]   ;;  %s2149_s0 = inlined_call_operand.vmem [shape: bf16[224,32], index: 0, kind: input, shape index: {}]   ;;  %s2150_s3 = inlined_call_operand.vmem [shape: f32[64,16], index: 3, kind: input, shape index: {}]   ;;  %s2151_s2 = inlined_call_operand.vmem [shape: f32[1,64], index: 2, kind: input, shape index: {}]   ;;  %s2152_s4 = inlined_call_operand.vmem [shape: f32[1,16], index: 4, kind: input, shape index: {}]   ;;  %s2153_s5 = inlined_call_operand.vmem [shape: f32[224,16], index: 5, kind: output, shape index: {}]  }
   0x1   :  { %v76_v0 = vld [vmem:[%s2148_s1] sm:$0xff]  ;;  %v77_v1 = vld [vmem:[%s2148_s1 + $0x8] sm:$0xff]  ;;  %v78_v2 = vld [vmem:[%s2148_s1 + $0x10] sm:$0xff] }
   0x2   :  { %v1382_v3 = vpack.c.bf16 %v77_v1, %v76_v0  ;;  %v79_v4 = vld [vmem:[%s2148_s1 + $0x18] sm:$0xff]  ;;  %v1138_v5 = vld [vmem:[%s2149_s0] sm:$0xff]   ;;  %v1193_v8 = vld [vmem:[%s2149_s0 + $0x8] sm:$0xff]  }
   0x3   :  { %v1386_v6 = vpack.c.bf16 %v79_v4, %v78_v2  ;;  %v1139_v7 = vunpack.c.l.bf16 %v1138_v5  ;;  %v405_v9 = vld [vmem:[%s2150_s3] sm:$0xff]  ;;  %v406_v10 = vld [vmem:[%s2150_s3 + $0x8] sm:$0xff]  ;;  %v407_v11 = vld [vmem:[%s2150_s3 + $0x10] sm:$0xff]  ;;  %v1140_v12 = vunpack.c.h.bf16 %v1138_v5  ;;  %v1143_v14 = vunpack.c.l.bf16 %v1193_v8 }
   0x4   :  { %1383 = vmatprep.subr.bf16.mxu0 %v1382_v3  ;;  %v408_v13 = vld [vmem:[%s2150_s3 + $0x18] sm:$0xff]  ;;  %v1194_v15 = vld [vmem:[%s2149_s0 + $0x10] sm:$0xff]   ;;  %v1390_v16 = vpack.c.bf16 %v406_v10, %v405_v9  ;;  %v409_v18 = vld [vmem:[%s2150_s3 + $0x20] sm:$0xff]  ;;  %v1144_v20 = vunpack.c.h.bf16 %v1193_v8 }
   0x5   :  { %1385 = vmatpush3.bf16.msra.mxu0 %v1382_v3  ;;  %1282 = vmatprep.mubr.msk.f32.mxu0 %vm87_vm0, %v1139_v7  ;;  %v1394_v17 = vpack.c.bf16 %v408_v13, %v407_v11  ;;  %v410_v19 = vld [vmem:[%s2150_s3 + $0x28] sm:$0xff]  ;;  %v1147_v21 = vunpack.c.l.bf16 %v1194_v15  ;;  %v1195_v22 = vld [vmem:[%s2149_s0 + $0x18] sm:$0xff]   ;;  %v411_v24 = vld [vmem:[%s2150_s3 + $0x30] sm:$0xff]  ;;  %v1148_v26 = vunpack.c.h.bf16 %v1194_v15 }
   0x6   :  { %1387 = vmatprep.subr.bf16.mxu0 %v1386_v6  ;;  %v1398_v23 = vpack.c.bf16 %v410_v19, %v409_v18  ;;  %1406 = vmatprep.subr.bf16.mxu1 %v1390_v16  ;;  %v412_v25 = vld [vmem:[%s2150_s3 + $0x38] sm:$0xff]  ;;  %v1151_v27 = vunpack.c.l.bf16 %v1195_v22  ;;  %v1196_v28 = vld [vmem:[%s2149_s0 + $0x20] sm:$0xff]   ;;  %v1152_v30 = vunpack.c.h.bf16 %v1195_v22  ;;  %v1197_v32 = vld [vmem:[%s2149_s0 + $0x28] sm:$0xff]  }
   0x7   :  { %1410 = vmatpush3.bf16.msra.mxu1 %v1390_v16  ;;  %v1402_v29 = vpack.c.bf16 %v412_v25, %v411_v24  ;;  %v1155_v31 = vunpack.c.l.bf16 %v1196_v28  ;;  %v1156_v33 = vunpack.c.h.bf16 %v1196_v28  ;;  %v1159_v34 = vunpack.c.l.bf16 %v1197_v32  ;;  %v1198_v35 = vld [vmem:[%s2149_s0 + $0x30] sm:$0xff]   ;;  %v1199_v38 = vld [vmem:[%s2149_s0 + $0x38] sm:$0xff]   ;;  %v1200_v41 = vld [vmem:[%s2149_s0 + $0x40] sm:$0xff]  }
   0x8   :  { %1407 = vmatprep.subr.bf16.mxu1 %v1394_v17  ;;  %v1160_v36 = vunpack.c.h.bf16 %v1197_v32  ;;  %v1163_v37 = vunpack.c.l.bf16 %v1198_v35  ;;  %v1164_v39 = vunpack.c.h.bf16 %v1198_v35  ;;  %v1167_v40 = vunpack.c.l.bf16 %v1199_v38  ;;  %v1201_v44 = vld [vmem:[%s2149_s0 + $0x48] sm:$0xff]   ;;  %v1202_v47 = vld [vmem:[%s2149_s0 + $0x50] sm:$0xff]   ;;  %v1203_v50 = vld [vmem:[%s2149_s0 + $0x58] sm:$0xff]  }
   0x9   :  { %1389 = vmatpush3.bf16.msra.mxu0 %v1386_v6  ;;  %v1168_v42 = vunpack.c.h.bf16 %v1199_v38  ;;  %v1171_v43 = vunpack.c.l.bf16 %v1200_v41  ;;  %v1172_v45 = vunpack.c.h.bf16 %v1200_v41  ;;  %v1175_v46 = vunpack.c.l.bf16 %v1201_v44  ;;  %v1204_v53 = vld [vmem:[%s2149_s0 + $0x60] sm:$0xff]   ;;  %v1205_v56 = vld [vmem:[%s2149_s0 + $0x68] sm:$0xff]  }
   0xa   :  { %1391 = vmatprep.subr.bf16.mxu0 %v1390_v16  ;;  %v1176_v48 = vunpack.c.h.bf16 %v1201_v44  ;;  %v1179_v49 = vunpack.c.l.bf16 %v1202_v47  ;;  %v1180_v51 = vunpack.c.h.bf16 %v1202_v47  ;;  %v1183_v52 = vunpack.c.l.bf16 %v1203_v50  ;;  %v1665_v60 = vld [vmem:[%s2151_s2] ss:$0 sm:$0xff] }
   0xb   :  { %1411 = vmatpush3.bf16.msra.mxu1 %v1394_v17  ;;  %v1184_v54 = vunpack.c.h.bf16 %v1203_v50  ;;  %v1187_v55 = vunpack.c.l.bf16 %v1204_v53  ;;  %v1188_v57 = vunpack.c.h.bf16 %v1204_v53  ;;  %v1191_v58 = vunpack.c.l.bf16 %v1205_v56 }
   0xc   :  { %1283 = vmatmul.mubr.msk.f32.vlgmr.msra.gmra.mrb[0].mxu0 %vm87_vm0, %v1140_v12  ;;  %1408 = vmatprep.subr.bf16.mxu1 %v1398_v23  ;;  %v1192_v59 = vunpack.c.h.bf16 %v1205_v56 }
   0xd   :  { %1285 = vmatprep.mubr.msk.f32.mxu0 %vm87_vm0, %v1143_v14  ;;  %1393 = vmatpush3.bf16.msra.mxu0 %v1390_v16 }
   0xe   :  { %1395 = vmatprep.subr.bf16.mxu0 %v1394_v17 }
   0xf   :  { %1412 = vmatpush3.bf16.msra.mxu1 %v1398_v23 }
  0x10   :  { %1286 = vmatmul.mubr.msk.f32.gmra.mrb[2].mxu0 %vm87_vm0, %v1144_v20  ;;  %1409 = vmatprep.subr.bf16.mxu1 %v1402_v29 }
  0x11   :  { %1288 = vmatprep.mubr.msk.f32.mxu0 %vm87_vm0, %v1147_v21  ;;  %1397 = vmatpush3.bf16.msra.mxu0 %v1394_v17 }
  0x12   :  { %1399 = vmatprep.subr.bf16.mxu0 %v1398_v23 }
  0x13   :  { %1413 = vmatpush3.bf16.msra.mxu1 %v1402_v29 }
  0x14   :  { %1289 = vmatmul.mubr.msk.f32.gmra.mrb[4].mxu0 %vm87_vm0, %v1148_v26 }
  0x15   :  { %1291 = vmatprep.mubr.msk.f32.mxu0 %vm87_vm0, %v1151_v27  ;;  %1401 = vmatpush3.bf16.msra.mxu0 %v1398_v23 }
  0x16   :  { %1403 = vmatprep.subr.bf16.mxu0 %v1402_v29 }
  0x18   :  { %1292 = vmatmul.mubr.msk.f32.gmra.mrb[6].mxu0 %vm87_vm0, %v1152_v30 }
  0x19   :  { %1294 = vmatprep.mubr.msk.f32.mxu0 %vm87_vm0, %v1155_v31  ;;  %1405 = vmatpush3.bf16.msra.mxu0 %v1402_v29 }
  0x1c   :  { %1295 = vmatmul.mubr.msk.f32.gmra.mrb[8].mxu0 %vm87_vm0, %v1156_v33 }
  0x1d   :  { %1297 = vmatprep.mubr.msk.f32.mxu0 %vm87_vm0, %v1159_v34 }
  0x20   :  { %1298 = vmatmul.mubr.msk.f32.gmra.mrb[10].mxu0 %vm87_vm0, %v1160_v36 }
  0x21   :  { %1300 = vmatprep.mubr.msk.f32.mxu0 %vm87_vm0, %v1163_v37 }
  0x24   :  { %1301 = vmatmul.mubr.msk.f32.gmra.mrb[12].mxu0 %vm87_vm0, %v1164_v39 }
  0x25   :  { %1303 = vmatprep.mubr.msk.f32.mxu0 %vm87_vm0, %v1167_v40 }
  0x28   :  { %1304 = vmatmul.mubr.msk.f32.gmra.mrb[14].mxu0 %vm87_vm0, %v1168_v42 }
  0x29   :  { %1306 = vmatprep.mubr.msk.f32.mxu0 %vm87_vm0, %v1171_v43 }
  0x2c   :  { %1307 = vmatmul.mubr.msk.f32.gmra.mrb[16].mxu0 %vm87_vm0, %v1172_v45 }
  0x2d   :  { %1309 = vmatprep.mubr.msk.f32.mxu0 %vm87_vm0, %v1175_v46 }
  0x30   :  { %1310 = vmatmul.mubr.msk.f32.gmra.mrb[18].mxu0 %vm87_vm0, %v1176_v48 }
  0x31   :  { %1312 = vmatprep.mubr.msk.f32.mxu0 %vm87_vm0, %v1179_v49 }
  0x34   :  { %1313 = vmatmul.mubr.msk.f32.gmra.mrb[20].mxu0 %vm87_vm0, %v1180_v51 }
  0x35   :  { %1315 = vmatprep.mubr.msk.f32.mxu0 %vm87_vm0, %v1183_v52 }
  0x38   :  { %1316 = vmatmul.mubr.msk.f32.gmra.mrb[22].mxu0 %vm87_vm0, %v1184_v54 }
  0x39   :  { %1318 = vmatprep.mubr.msk.f32.mxu0 %vm87_vm0, %v1187_v55 }
  0x3c   :  { %1319 = vmatmul.mubr.msk.f32.gmra.mrb[24].mxu0 %vm87_vm0, %v1188_v57 }
  0x3d   :  { %1321 = vmatprep.mubr.msk.f32.mxu0 %vm87_vm0, %v1191_v58 }
  0x40   :  { %1322 = vmatmul.mubr.msk.f32.gmra.mrb[26].mxu0 %vm87_vm0, %v1192_v59 }
  0xdf   :  { %v1284_v61 = vpop.f32.mrb[0].mxu0 }
  0xe0   :  { %v244_v62 = vadd.f32 %v1284_v61, %v1665_v60  ;;  %v238_v63 = vpop.f32.mrb[1].mxu0 }
  0xe1   :  { %v239_v0 = vadd.f32 %v1665_v60, %v238_v63 }
  0xe2   :  { %v378_v3 = vmax.f32 %v244_v62, 0.0 }
  0xe3   :  { %v377_v1 = vmax.f32 %v239_v0, 0.0  ;;  %v1287_v2 = vpop.f32.mrb[2].mxu0 }
  0xe4   :  { %v254_v4 = vadd.f32 %v1287_v2, %v1665_v60  ;;  %v248_v5 = vpop.f32.mrb[3].mxu0 }
  0xe5   :  { %v249_v6 = vadd.f32 %v1665_v60, %v248_v5  ;;  %1340 = vmatprep.mubr.msk.f32.mxu0 %vm420_vm1, %v377_v1 }
  0xe6   :  { %1341 = vmatmul.mubr.msk.f32.vlgmr.msra.gmra.mrb[28].mxu0 %vm420_vm1, %v378_v3  ;;  %v380_v9 = vmax.f32 %v254_v4, 0.0 }
  0xe7   :  { %v379_v7 = vmax.f32 %v249_v6, 0.0  ;;  %v1290_v8 = vpop.f32.mrb[4].mxu0 }
  0xe8   :  { %v264_v10 = vadd.f32 %v1290_v8, %v1665_v60  ;;  %v258_v11 = vpop.f32.mrb[5].mxu0 }
  0xe9   :  { %v259_v12 = vadd.f32 %v1665_v60, %v258_v11  ;;  %1343 = vmatprep.mubr.msk.f32.mxu1 %vm420_vm1, %v379_v7 }
  0xea   :  { %v382_v13 = vmax.f32 %v264_v10, 0.0  ;;  %1344 = vmatmul.mubr.msk.f32.vlgmr.msra.gmra.mrb[0].mxu1 %vm420_vm1, %v380_v9 }
  0xeb   :  { %v381_v14 = vmax.f32 %v259_v12, 0.0  ;;  %v1293_v15 = vpop.f32.mrb[6].mxu0 }
  0xec   :  { %v274_v16 = vadd.f32 %v1293_v15, %v1665_v60  ;;  %v268_v17 = vpop.f32.mrb[7].mxu0 }
  0xed   :  { %v269_v18 = vadd.f32 %v1665_v60, %v268_v17  ;;  %1346 = vmatprep.mubr.msk.f32.mxu1 %vm420_vm1, %v381_v14 }
  0xee   :  { %v384_v19 = vmax.f32 %v274_v16, 0.0  ;;  %1347 = vmatmul.mubr.msk.f32.gmra.mrb[2].mxu1 %vm420_vm1, %v382_v13 }
  0xef   :  { %v383_v20 = vmax.f32 %v269_v18, 0.0  ;;  %v1296_v21 = vpop.f32.mrb[8].mxu0  ;;  %v1726_v18 = vld [vmem:[%s2152_s4] ss:$0 sm:$0xff] }
  0xf0   :  { %v284_v22 = vadd.f32 %v1296_v21, %v1665_v60  ;;  %v278_v23 = vpop.f32.mrb[9].mxu0 }
  0xf1   :  { %v279_v24 = vadd.f32 %v1665_v60, %v278_v23  ;;  %1349 = vmatprep.mubr.msk.f32.mxu1 %vm420_vm1, %v383_v20 }
  0xf2   :  { %v386_v25 = vmax.f32 %v284_v22, 0.0  ;;  %1350 = vmatmul.mubr.msk.f32.gmra.mrb[4].mxu1 %vm420_vm1, %v384_v19 }
  0xf3   :  { %v385_v26 = vmax.f32 %v279_v24, 0.0  ;;  %v1299_v27 = vpop.f32.mrb[10].mxu0 }
  0xf4   :  { %v294_v28 = vadd.f32 %v1299_v27, %v1665_v60  ;;  %v288_v29 = vpop.f32.mrb[11].mxu0 }
  0xf5   :  { %v289_v30 = vadd.f32 %v1665_v60, %v288_v29  ;;  %1352 = vmatprep.mubr.msk.f32.mxu1 %vm420_vm1, %v385_v26 }
  0xf6   :  { %v388_v31 = vmax.f32 %v294_v28, 0.0  ;;  %1353 = vmatmul.mubr.msk.f32.gmra.mrb[6].mxu1 %vm420_vm1, %v386_v25 }
  0xf7   :  { %v387_v32 = vmax.f32 %v289_v30, 0.0  ;;  %v1302_v33 = vpop.f32.mrb[12].mxu0 }
  0xf8   :  { %v304_v34 = vadd.f32 %v1302_v33, %v1665_v60  ;;  %v298_v35 = vpop.f32.mrb[13].mxu0 }
  0xf9   :  { %v299_v36 = vadd.f32 %v1665_v60, %v298_v35  ;;  %1355 = vmatprep.mubr.msk.f32.mxu1 %vm420_vm1, %v387_v32 }
  0xfa   :  { %v390_v37 = vmax.f32 %v304_v34, 0.0  ;;  %1356 = vmatmul.mubr.msk.f32.gmra.mrb[8].mxu1 %vm420_vm1, %v388_v31 }
  0xfb   :  { %v389_v38 = vmax.f32 %v299_v36, 0.0  ;;  %v1305_v39 = vpop.f32.mrb[14].mxu0 }
  0xfc   :  { %v314_v40 = vadd.f32 %v1305_v39, %v1665_v60  ;;  %v308_v41 = vpop.f32.mrb[15].mxu0 }
  0xfd   :  { %v309_v42 = vadd.f32 %v1665_v60, %v308_v41  ;;  %1358 = vmatprep.mubr.msk.f32.mxu1 %vm420_vm1, %v389_v38 }
  0xfe   :  { %v392_v43 = vmax.f32 %v314_v40, 0.0  ;;  %1359 = vmatmul.mubr.msk.f32.gmra.mrb[10].mxu1 %vm420_vm1, %v390_v37 }
  0xff   :  { %v391_v44 = vmax.f32 %v309_v42, 0.0  ;;  %v1308_v45 = vpop.f32.mrb[16].mxu0 }
 0x100   :  { %v324_v46 = vadd.f32 %v1308_v45, %v1665_v60  ;;  %v318_v47 = vpop.f32.mrb[17].mxu0 }
 0x101   :  { %v319_v48 = vadd.f32 %v1665_v60, %v318_v47  ;;  %1361 = vmatprep.mubr.msk.f32.mxu1 %vm420_vm1, %v391_v44 }
 0x102   :  { %v394_v49 = vmax.f32 %v324_v46, 0.0  ;;  %1362 = vmatmul.mubr.msk.f32.gmra.mrb[12].mxu1 %vm420_vm1, %v392_v43 }
 0x103   :  { %v393_v50 = vmax.f32 %v319_v48, 0.0  ;;  %v1311_v51 = vpop.f32.mrb[18].mxu0 }
 0x104   :  { %v334_v52 = vadd.f32 %v1311_v51, %v1665_v60  ;;  %v328_v53 = vpop.f32.mrb[19].mxu0 }
 0x105   :  { %v329_v54 = vadd.f32 %v1665_v60, %v328_v53  ;;  %1364 = vmatprep.mubr.msk.f32.mxu1 %vm420_vm1, %v393_v50 }
 0x106   :  { %v396_v55 = vmax.f32 %v334_v52, 0.0  ;;  %1365 = vmatmul.mubr.msk.f32.gmra.mrb[14].mxu1 %vm420_vm1, %v394_v49 }
 0x107   :  { %v395_v56 = vmax.f32 %v329_v54, 0.0  ;;  %v1314_v57 = vpop.f32.mrb[20].mxu0 }
 0x108   :  { %v344_v58 = vadd.f32 %v1314_v57, %v1665_v60  ;;  %v338_v59 = vpop.f32.mrb[21].mxu0 }
 0x109   :  { %v339_v61 = vadd.f32 %v1665_v60, %v338_v59  ;;  %1367 = vmatprep.mubr.msk.f32.mxu1 %vm420_vm1, %v395_v56 }
 0x10a   :  { %v398_v62 = vmax.f32 %v344_v58, 0.0  ;;  %1368 = vmatmul.mubr.msk.f32.gmra.mrb[16].mxu1 %vm420_vm1, %v396_v55 }
 0x10b   :  { %v397_v63 = vmax.f32 %v339_v61, 0.0  ;;  %v1317_v0 = vpop.f32.mrb[22].mxu0 }
 0x10c   :  { %v354_v1 = vadd.f32 %v1317_v0, %v1665_v60  ;;  %v348_v2 = vpop.f32.mrb[23].mxu0 }
 0x10d   :  { %v349_v3 = vadd.f32 %v1665_v60, %v348_v2  ;;  %1370 = vmatprep.mubr.msk.f32.mxu1 %vm420_vm1, %v397_v63 }
 0x10e   :  { %v400_v4 = vmax.f32 %v354_v1, 0.0  ;;  %1371 = vmatmul.mubr.msk.f32.gmra.mrb[18].mxu1 %vm420_vm1, %v398_v62 }
 0x10f   :  { %v399_v5 = vmax.f32 %v349_v3, 0.0  ;;  %v1320_v6 = vpop.f32.mrb[24].mxu0 }
 0x110   :  { %v364_v7 = vadd.f32 %v1320_v6, %v1665_v60  ;;  %v358_v8 = vpop.f32.mrb[25].mxu0 }
 0x111   :  { %v359_v9 = vadd.f32 %v1665_v60, %v358_v8  ;;  %1373 = vmatprep.mubr.msk.f32.mxu1 %vm420_vm1, %v399_v5 }
 0x112   :  { %v402_v10 = vmax.f32 %v364_v7, 0.0  ;;  %1374 = vmatmul.mubr.msk.f32.gmra.mrb[20].mxu1 %vm420_vm1, %v400_v4 }
 0x113   :  { %v401_v11 = vmax.f32 %v359_v9, 0.0  ;;  %v1323_v12 = vpop.f32.mrb[26].mxu0 }
 0x114   :  { %v374_v13 = vadd.f32 %v1323_v12, %v1665_v60  ;;  %v368_v14 = vpop.f32.mrb[27].mxu0 }
 0x115   :  { %v369_v15 = vadd.f32 %v1665_v60, %v368_v14  ;;  %1376 = vmatprep.mubr.msk.f32.mxu1 %vm420_vm1, %v401_v11 }
 0x116   :  { %v404_v16 = vmax.f32 %v374_v13, 0.0  ;;  %1377 = vmatmul.mubr.msk.f32.gmra.mrb[22].mxu1 %vm420_vm1, %v402_v10 }
 0x117   :  { %v403_v17 = vmax.f32 %v369_v15, 0.0 }
 0x119   :  { %1379 = vmatprep.mubr.msk.f32.mxu1 %vm420_vm1, %v403_v17 }
 0x11a   :  { %1380 = vmatmul.mubr.msk.f32.gmra.mrb[24].mxu1 %vm420_vm1, %v404_v16 }
 0x1b9   :  { %v1342_v19 = vpop.f32.mrb[28].mxu0 }
 0x1ba   :  { %v1729_v20 = vadd.f32 %v1342_v19, %v1726_v18  ;;  %v571_v60 = vpop.f32.mrb[29].mxu0 }
 0x1bb   :  { %v1732_v21 = vadd.f32 %v1726_v18, %v571_v60 }
 0x1bc   :  { %v714_v22 = vsel %vm710_vm2, %v1729_v20, -inf }
 0x1bd   :  { %v1345_v23 = vpop.f32.mrb[0].mxu1  ;;  %715 = vmax.xlane.f32.xlu0 %v714_v22  ;;  %v711_v28 = vsel %vm710_vm2, %v1732_v21, -inf }
 0x1be   :  { %v1737_v24 = vadd.f32 %v1345_v23, %v1726_v18  ;;  %v581_v25 = vpop.f32.mrb[1].mxu1 }
 0x1bf   :  { %v1740_v26 = vadd.f32 %v1726_v18, %v581_v25 }
 0x1c0   :  { %v720_v27 = vsel %vm710_vm2, %v1737_v24, -inf }
 0x1c1   :  { %721 = vmax.xlane.f32.xlu1 %v720_v27  ;;  %v1348_v29 = vpop.f32.mrb[2].mxu1  ;;  %712 = vmax.xlane.f32.xlu0 %v711_v28  ;;  %v717_v33 = vsel %vm710_vm2, %v1740_v26, -inf }
 0x1c2   :  { %v591_v30 = vpop.f32.mrb[3].mxu1  ;;  %v1750_v32 = vadd.f32 %v1348_v29, %v1726_v18 }
 0x1c3   :  { %v1747_v31 = vadd.f32 %v1726_v18, %v591_v30 }
 0x1c4   :  { %v726_v39 = vsel %vm710_vm2, %v1750_v32, -inf }
 0x1c5   :  { %v1351_v34 = vpop.f32.mrb[4].mxu1  ;;  %718 = vmax.xlane.f32.xlu1 %v717_v33  ;;  %v723_v35 = vsel %vm710_vm2, %v1747_v31, -inf }
 0x1c6   :  { %v601_v36 = vpop.f32.mrb[5].mxu1  ;;  %724 = vmax.xlane.f32.xlu0 %v723_v35  ;;  %v1760_v38 = vadd.f32 %v1351_v34, %v1726_v18 }
 0x1c7   :  { %v1757_v37 = vadd.f32 %v1726_v18, %v601_v36 }
 0x1c8   :  { %v732_v45 = vsel %vm710_vm2, %v1760_v38, -inf }
 0x1c9   :  { %v1354_v40 = vpop.f32.mrb[6].mxu1  ;;  %727 = vmax.xlane.f32.xlu1 %v726_v39  ;;  %v729_v41 = vsel %vm710_vm2, %v1757_v37, -inf }
 0x1ca   :  { %v611_v42 = vpop.f32.mrb[7].mxu1  ;;  %730 = vmax.xlane.f32.xlu0 %v729_v41  ;;  %v1770_v44 = vadd.f32 %v1354_v40, %v1726_v18 }
 0x1cb   :  { %v1767_v43 = vadd.f32 %v1726_v18, %v611_v42 }
 0x1cc   :  { %v738_v51 = vsel %vm710_vm2, %v1770_v44, -inf }
 0x1cd   :  { %v1357_v46 = vpop.f32.mrb[8].mxu1  ;;  %733 = vmax.xlane.f32.xlu1 %v732_v45  ;;  %v735_v47 = vsel %vm710_vm2, %v1767_v43, -inf }
 0x1ce   :  { %v621_v48 = vpop.f32.mrb[9].mxu1  ;;  %736 = vmax.xlane.f32.xlu0 %v735_v47  ;;  %v1780_v50 = vadd.f32 %v1357_v46, %v1726_v18 }
 0x1cf   :  { %v1777_v49 = vadd.f32 %v1726_v18, %v621_v48 }
 0x1d0   :  { %v744_v57 = vsel %vm710_vm2, %v1780_v50, -inf }
 0x1d1   :  { %v1360_v52 = vpop.f32.mrb[10].mxu1  ;;  %739 = vmax.xlane.f32.xlu1 %v738_v51  ;;  %v741_v53 = vsel %vm710_vm2, %v1777_v49, -inf }
 0x1d2   :  { %v631_v54 = vpop.f32.mrb[11].mxu1  ;;  %742 = vmax.xlane.f32.xlu0 %v741_v53  ;;  %v1790_v56 = vadd.f32 %v1360_v52, %v1726_v18 }
 0x1d3   :  { %v1787_v55 = vadd.f32 %v1726_v18, %v631_v54 }
 0x1d4   :  { %v750_v0 = vsel %vm710_vm2, %v1790_v56, -inf }
 0x1d5   :  { %v1363_v58 = vpop.f32.mrb[12].mxu1  ;;  %745 = vmax.xlane.f32.xlu1 %v744_v57  ;;  %v747_v59 = vsel %vm710_vm2, %v1787_v55, -inf }
 0x1d6   :  { %v641_v61 = vpop.f32.mrb[13].mxu1  ;;  %748 = vmax.xlane.f32.xlu0 %v747_v59  ;;  %v1800_v63 = vadd.f32 %v1363_v58, %v1726_v18 }
 0x1d7   :  { %v1797_v62 = vadd.f32 %v1726_v18, %v641_v61 }
 0x1d8   :  { %v756_v6 = vsel %vm710_vm2, %v1800_v63, -inf }
 0x1d9   :  { %v1366_v1 = vpop.f32.mrb[14].mxu1  ;;  %751 = vmax.xlane.f32.xlu1 %v750_v0  ;;  %v753_v2 = vsel %vm710_vm2, %v1797_v62, -inf }
 0x1da   :  { %v651_v3 = vpop.f32.mrb[15].mxu1  ;;  %754 = vmax.xlane.f32.xlu0 %v753_v2  ;;  %v1810_v5 = vadd.f32 %v1366_v1, %v1726_v18 }
 0x1db   :  { %v1807_v4 = vadd.f32 %v1726_v18, %v651_v3 }
 0x1dc   :  { %v762_v12 = vsel %vm710_vm2, %v1810_v5, -inf }
 0x1dd   :  { %v1369_v7 = vpop.f32.mrb[16].mxu1  ;;  %757 = vmax.xlane.f32.xlu1 %v756_v6  ;;  %v759_v8 = vsel %vm710_vm2, %v1807_v4, -inf }
 0x1de   :  { %v661_v9 = vpop.f32.mrb[17].mxu1  ;;  %760 = vmax.xlane.f32.xlu0 %v759_v8  ;;  %v1820_v11 = vadd.f32 %v1369_v7, %v1726_v18 }
 0x1df   :  { %v1817_v10 = vadd.f32 %v1726_v18, %v661_v9 }
 0x1e0   :  { %v768_v19 = vsel %vm710_vm2, %v1820_v11, -inf }
 0x1e1   :  { %v1372_v13 = vpop.f32.mrb[18].mxu1  ;;  %763 = vmax.xlane.f32.xlu1 %v762_v12  ;;  %v765_v14 = vsel %vm710_vm2, %v1817_v10, -inf }
 0x1e2   :  { %v671_v15 = vpop.f32.mrb[19].mxu1  ;;  %766 = vmax.xlane.f32.xlu0 %v765_v14  ;;  %v1830_v17 = vadd.f32 %v1372_v13, %v1726_v18 }
 0x1e3   :  { %v1827_v16 = vadd.f32 %v1726_v18, %v671_v15 }
 0x1e4   :  { %v774_v28 = vsel %vm710_vm2, %v1830_v17, -inf }
 0x1e5   :  { %v1375_v60 = vpop.f32.mrb[20].mxu1  ;;  %769 = vmax.xlane.f32.xlu1 %v768_v19  ;;  %v771_v22 = vsel %vm710_vm2, %v1827_v16, -inf }
 0x1e6   :  { %v681_v23 = vpop.f32.mrb[21].mxu1  ;;  %772 = vmax.xlane.f32.xlu0 %v771_v22  ;;  %v1840_v27 = vadd.f32 %v1375_v60, %v1726_v18 }
 0x1e7   :  { %v1837_v25 = vadd.f32 %v1726_v18, %v681_v23 }
 0x1e8   :  { %v780_v36 = vsel %vm710_vm2, %v1840_v27, -inf }
 0x1e9   :  { %v1378_v29 = vpop.f32.mrb[22].mxu1  ;;  %775 = vmax.xlane.f32.xlu1 %v774_v28  ;;  %v777_v30 = vsel %vm710_vm2, %v1837_v25, -inf }
 0x1ea   :  { %v691_v33 = vpop.f32.mrb[23].mxu1  ;;  %778 = vmax.xlane.f32.xlu0 %v777_v30  ;;  %v1850_v35 = vadd.f32 %v1378_v29, %v1726_v18 }
 0x1eb   :  { %v1847_v34 = vadd.f32 %v1726_v18, %v691_v33 }
 0x1ec   :  { %v786_v46 = vsel %vm710_vm2, %v1850_v35, -inf }
 0x1ed   :  { %v1381_v39 = vpop.f32.mrb[24].mxu1  ;;  %781 = vmax.xlane.f32.xlu1 %v780_v36  ;;  %v783_v40 = vsel %vm710_vm2, %v1847_v34, -inf }
 0x1ee   :  { %v701_v41 = vpop.f32.mrb[25].mxu1  ;;  %784 = vmax.xlane.f32.xlu0 %v783_v40  ;;  %v1860_v45 = vadd.f32 %v1381_v39, %v1726_v18 }
 0x1ef   :  { %v1857_v42 = vadd.f32 %v1726_v18, %v701_v41 }
 0x1f0   :  { %v792_v48 = vsel %vm710_vm2, %v1860_v45, -inf }
 0x1f1   :  { %787 = vmax.xlane.f32.xlu1 %v786_v46  ;;  %v789_v47 = vsel %vm710_vm2, %v1857_v42, -inf }
 0x1f2   :  { %790 = vmax.xlane.f32.xlu0 %v789_v47 }
 0x1f5   :  { %793 = vmax.xlane.f32.xlu1 %v792_v48 }
 0x24a   :  { %v716_v51 = vpop.xlane.xlu0 %715 }
 0x24b   :  { %v1869_v52 = vsub.f32 %v1729_v20, %v716_v51 }
 0x24d   :  { %v825_v53 = vmul.f32 1.442695, %v1869_v52 }
 0x24e   :  { %v722_v18 = vpop.xlane.xlu1 %721  ;;  %v713_v54 = vpop.xlane.xlu0 %712 }
 0x24f   :  { %1414 = vpow2.f32 %v825_v53  ;;  %v1873_v57 = vsub.f32 %v1737_v24, %v722_v18  ;;  %v1876_v58 = vsub.f32 %v1732_v21, %v713_v54 }
 0x251   :  { %v829_v59 = vmul.f32 1.442695, %v1873_v57  ;;  %v823_v61 = vmul.f32 1.442695, %v1876_v58 }
 0x252   :  { %v719_v0 = vpop.xlane.xlu1 %718 }
 0x253   :  { %1416 = vpow2.f32 %v829_v59  ;;  %v1881_v20 = vsub.f32 %v1740_v26, %v719_v0  ;;  %v725_v1 = vpop.xlane.xlu0 %724 }
 0x254   :  { %1418 = vpow2.f32 %v823_v61  ;;  %v1884_v2 = vsub.f32 %v1747_v31, %v725_v1 }
 0x255   :  { %v827_v24 = vmul.f32 1.442695, %v1881_v20 }
 0x256   :  { %v831_v3 = vmul.f32 1.442695, %v1884_v2  ;;  %v728_v21 = vpop.xlane.xlu1 %727 }
 0x257   :  { %1420 = vpow2.f32 %v827_v24  ;;  %v1889_v6 = vsub.f32 %v1750_v32, %v728_v21  ;;  %v731_v7 = vpop.xlane.xlu0 %730 }
 0x258   :  { %v1892_v8 = vsub.f32 %v1757_v37, %v731_v7  ;;  %1422 = vpow2.f32 %v831_v3 }
 0x259   :  { %v1415_v26 = vpop.eup %1414  ;;  %v833_v9 = vmul.f32 1.442695, %v1889_v6 }
 0x25a   :  { %v835_v31 = vmul.f32 1.442695, %v1892_v8  ;;  %v734_v12 = vpop.xlane.xlu1 %733  ;;  %v882_v13 = vsel %vm710_vm2, %v1415_v26, 0.0 }
 0x25b   :  { %1424 = vpow2.f32 %v833_v9  ;;  %v1898_v14 = vsub.f32 %v1760_v38, %v734_v12  ;;  %883 = vadd.xlane.f32.xlu1 %v882_v13  ;;  %v737_v32 = vpop.xlane.xlu0 %736 }
 0x25c   :  { %v1901_v15 = vsub.f32 %v1767_v43, %v737_v32  ;;  %1426 = vpow2.f32 %v835_v31 }
 0x25d   :  { %v1417_v37 = vpop.eup %1416  ;;  %v837_v19 = vmul.f32 1.442695, %v1898_v14 }
 0x25e   :  { %v1419_v60 = vpop.eup %1418  ;;  %v839_v22 = vmul.f32 1.442695, %v1901_v15  ;;  %v740_v23 = vpop.xlane.xlu1 %739  ;;  %v888_v28 = vsel %vm710_vm2, %v1417_v37, 0.0 }
 0x25f   :  { %1428 = vpow2.f32 %v837_v19  ;;  %v1907_v29 = vsub.f32 %v1770_v44, %v740_v23  ;;  %889 = vadd.xlane.f32.xlu1 %v888_v28  ;;  %v879_v38 = vsel %vm710_vm2, %v1419_v60, 0.0  ;;  %v743_v30 = vpop.xlane.xlu0 %742 }
 0x260   :  { %880 = vadd.xlane.f32.xlu0 %v879_v38  ;;  %v1911_v43 = vsub.f32 %v1777_v49, %v743_v30  ;;  %1430 = vpow2.f32 %v839_v22 }
 0x261   :  { %v1421_v33 = vpop.eup %1420  ;;  %v841_v36 = vmul.f32 1.442695, %v1907_v29 }
 0x262   :  { %v843_v39 = vmul.f32 1.442695, %v1911_v43  ;;  %v746_v40 = vpop.xlane.xlu1 %745  ;;  %v885_v41 = vsel %vm710_vm2, %v1421_v33, 0.0  ;;  %v1423_v47 = vpop.eup %1422 }
 0x263   :  { %1432 = vpow2.f32 %v841_v36  ;;  %v1917_v44 = vsub.f32 %v1780_v50, %v746_v40  ;;  %v749_v46 = vpop.xlane.xlu0 %748  ;;  %v891_v50 = vsel %vm710_vm2, %v1423_v47, 0.0 }
 0x264   :  { %886 = vadd.xlane.f32.xlu0 %v885_v41  ;;  %v1920_v48 = vsub.f32 %v1787_v55, %v749_v46  ;;  %1434 = vpow2.f32 %v843_v39 }
 0x265   :  { %v1425_v49 = vpop.eup %1424  ;;  %v845_v51 = vmul.f32 1.442695, %v1917_v44 }
 0x266   :  { %v847_v53 = vmul.f32 1.442695, %v1920_v48  ;;  %v752_v18 = vpop.xlane.xlu1 %751  ;;  %v894_v54 = vsel %vm710_vm2, %v1425_v49, 0.0  ;;  %v1427_v0 = vpop.eup %1426 }
 0x267   :  { %1436 = vpow2.f32 %v845_v51  ;;  %v1926_v59 = vsub.f32 %v1790_v56, %v752_v18  ;;  %895 = vadd.xlane.f32.xlu1 %v894_v54  ;;  %v755_v61 = vpop.xlane.xlu0 %754  ;;  %v897_v26 = vsel %vm710_vm2, %v1427_v0, 0.0 }
 0x268   :  { %892 = vadd.xlane.f32.xlu0 %v891_v50  ;;  %v1930_v55 = vsub.f32 %v1797_v62, %v755_v61  ;;  %1438 = vpow2.f32 %v847_v53 }
 0x269   :  { %v1429_v1 = vpop.eup %1428  ;;  %v849_v24 = vmul.f32 1.442695, %v1926_v59 }
 0x26a   :  { %v851_v3 = vmul.f32 1.442695, %v1930_v55  ;;  %v758_v21 = vpop.xlane.xlu1 %757  ;;  %v900_v7 = vsel %vm710_vm2, %v1429_v1, 0.0  ;;  %v1431_v31 = vpop.eup %1430 }
 0x26b   :  { %1440 = vpow2.f32 %v849_v24  ;;  %v1936_v56 = vsub.f32 %v1800_v63, %v758_v21  ;;  %901 = vadd.xlane.f32.xlu1 %v900_v7  ;;  %v761_v9 = vpop.xlane.xlu0 %760  ;;  %v903_v60 = vsel %vm710_vm2, %v1431_v31, 0.0 }
 0x26c   :  { %898 = vadd.xlane.f32.xlu0 %v897_v26  ;;  %v1940_v62 = vsub.f32 %v1807_v4, %v761_v9  ;;  %1442 = vpow2.f32 %v851_v3 }
 0x26d   :  { %v1433_v12 = vpop.eup %1432  ;;  %v853_v13 = vmul.f32 1.442695, %v1936_v56 }
 0x26e   :  { %v855_v32 = vmul.f32 1.442695, %v1940_v62  ;;  %v764_v37 = vpop.xlane.xlu1 %763  ;;  %v906_v19 = vsel %vm710_vm2, %v1433_v12, 0.0  ;;  %v1435_v23 = vpop.eup %1434 }
 0x26f   :  { %1444 = vpow2.f32 %v853_v13  ;;  %v1946_v63 = vsub.f32 %v1810_v5, %v764_v37  ;;  %907 = vadd.xlane.f32.xlu1 %v906_v19  ;;  %v767_v22 = vpop.xlane.xlu0 %766  ;;  %v909_v39 = vsel %vm710_vm2, %v1435_v23, 0.0 }
 0x270   :  { %904 = vadd.xlane.f32.xlu0 %v903_v60  ;;  %v1950_v4 = vsub.f32 %v1817_v10, %v767_v22  ;;  %1446 = vpow2.f32 %v855_v32 }
 0x271   :  { %v1437_v28 = vpop.eup %1436  ;;  %v857_v38 = vmul.f32 1.442695, %v1946_v63 }
 0x272   :  { %v859_v30 = vmul.f32 1.442695, %v1950_v4  ;;  %v770_v33 = vpop.xlane.xlu1 %769  ;;  %v912_v36 = vsel %vm710_vm2, %v1437_v28, 0.0  ;;  %v1439_v41 = vpop.eup %1438 }
 0x273   :  { %1448 = vpow2.f32 %v857_v38  ;;  %v1956_v5 = vsub.f32 %v1820_v11, %v770_v33  ;;  %913 = vadd.xlane.f32.xlu1 %v912_v36  ;;  %v773_v40 = vpop.xlane.xlu0 %772  ;;  %v915_v18 = vsel %vm710_vm2, %v1439_v41, 0.0 }
 0x274   :  { %910 = vadd.xlane.f32.xlu0 %v909_v39  ;;  %v1960_v10 = vsub.f32 %v1827_v16, %v773_v40  ;;  %1450 = vpow2.f32 %v859_v30 }
 0x275   :  { %v1441_v46 = vpop.eup %1440  ;;  %v861_v47 = vmul.f32 1.442695, %v1956_v5 }
 0x276   :  { %v863_v49 = vmul.f32 1.442695, %v1960_v10  ;;  %v776_v51 = vpop.xlane.xlu1 %775  ;;  %v918_v53 = vsel %vm710_vm2, %v1441_v46, 0.0  ;;  %v1443_v50 = vpop.eup %1442 }
 0x277   :  { %1452 = vpow2.f32 %v861_v47  ;;  %v1966_v11 = vsub.f32 %v1830_v17, %v776_v51  ;;  %919 = vadd.xlane.f32.xlu1 %v918_v53  ;;  %v779_v54 = vpop.xlane.xlu0 %778  ;;  %v921_v21 = vsel %vm710_vm2, %v1443_v50, 0.0 }
 0x278   :  { %916 = vadd.xlane.f32.xlu0 %v915_v18  ;;  %v1970_v16 = vsub.f32 %v1837_v25, %v779_v54  ;;  %1454 = vpow2.f32 %v863_v49 }
 0x279   :  { %v1445_v61 = vpop.eup %1444  ;;  %v865_v0 = vmul.f32 1.442695, %v1966_v11 }
 0x27a   :  { %v867_v1 = vmul.f32 1.442695, %v1970_v16  ;;  %v782_v24 = vpop.xlane.xlu1 %781  ;;  %v924_v3 = vsel %vm710_vm2, %v1445_v61, 0.0  ;;  %v1447_v26 = vpop.eup %1446 }
 0x27b   :  { %1456 = vpow2.f32 %v865_v0  ;;  %v1976_v17 = vsub.f32 %v1840_v27, %v782_v24  ;;  %925 = vadd.xlane.f32.xlu1 %v924_v3  ;;  %v785_v7 = vpop.xlane.xlu0 %784  ;;  %v927_v37 = vsel %vm710_vm2, %v1447_v26, 0.0 }
 0x27c   :  { %922 = vadd.xlane.f32.xlu0 %v921_v21  ;;  %v1980_v25 = vsub.f32 %v1847_v34, %v785_v7  ;;  %1458 = vpow2.f32 %v867_v1 }
 0x27d   :  { %v1449_v9 = vpop.eup %1448  ;;  %v869_v31 = vmul.f32 1.442695, %v1976_v17 }
 0x27e   :  { %v871_v12 = vmul.f32 1.442695, %v1980_v25  ;;  %v788_v13 = vpop.xlane.xlu1 %787  ;;  %v930_v32 = vsel %vm710_vm2, %v1449_v9, 0.0  ;;  %v1451_v60 = vpop.eup %1450 }
 0x27f   :  { %1460 = vpow2.f32 %v869_v31  ;;  %v1986_v27 = vsub.f32 %v1850_v35, %v788_v13  ;;  %931 = vadd.xlane.f32.xlu1 %v930_v32  ;;  %v791_v19 = vpop.xlane.xlu0 %790  ;;  %v933_v33 = vsel %vm710_vm2, %v1451_v60, 0.0 }
 0x280   :  { %928 = vadd.xlane.f32.xlu0 %v927_v37  ;;  %v1990_v34 = vsub.f32 %v1857_v42, %v791_v19  ;;  %1462 = vpow2.f32 %v871_v12 }
 0x281   :  { %v1453_v22 = vpop.eup %1452  ;;  %v873_v23 = vmul.f32 1.442695, %v1986_v27 }
 0x282   :  { %v875_v28 = vmul.f32 1.442695, %v1990_v34  ;;  %v794_v38 = vpop.xlane.xlu1 %793  ;;  %v936_v30 = vsel %vm710_vm2, %v1453_v22, 0.0  ;;  %v1455_v36 = vpop.eup %1454 }
 0x283   :  { %1464 = vpow2.f32 %v873_v23  ;;  %v1996_v35 = vsub.f32 %v1860_v45, %v794_v38  ;;  %937 = vadd.xlane.f32.xlu1 %v936_v30  ;;  %v939_v41 = vsel %vm710_vm2, %v1455_v36, 0.0 }
 0x284   :  { %934 = vadd.xlane.f32.xlu0 %v933_v33  ;;  %1466 = vpow2.f32 %v875_v28 }
 0x285   :  { %v1457_v42 = vpop.eup %1456  ;;  %v877_v39 = vmul.f32 1.442695, %v1996_v35 }
 0x286   :  { %v942_v40 = vsel %vm710_vm2, %v1457_v42, 0.0  ;;  %v1459_v46 = vpop.eup %1458 }
 0x287   :  { %1468 = vpow2.f32 %v877_v39  ;;  %943 = vadd.xlane.f32.xlu1 %v942_v40  ;;  %v945_v49 = vsel %vm710_vm2, %v1459_v46, 0.0 }
 0x288   :  { %940 = vadd.xlane.f32.xlu0 %v939_v41 }
 0x289   :  { %v1461_v47 = vpop.eup %1460 }
 0x28a   :  { %v948_v45 = vsel %vm710_vm2, %v1461_v47, 0.0  ;;  %v1463_v51 = vpop.eup %1462 }
 0x28b   :  { %949 = vadd.xlane.f32.xlu1 %v948_v45  ;;  %v951_v54 = vsel %vm710_vm2, %v1463_v51, 0.0 }
 0x28c   :  { %946 = vadd.xlane.f32.xlu0 %v945_v49 }
 0x28d   :  { %v1465_v53 = vpop.eup %1464 }
 0x28e   :  { %v954_v18 = vsel %vm710_vm2, %v1465_v53, 0.0  ;;  %v1467_v50 = vpop.eup %1466 }
 0x28f   :  { %955 = vadd.xlane.f32.xlu1 %v954_v18  ;;  %v957_v1 = vsel %vm710_vm2, %v1467_v50, 0.0 }
 0x290   :  { %952 = vadd.xlane.f32.xlu0 %v951_v54 }
 0x291   :  { %v1469_v61 = vpop.eup %1468 }
 0x292   :  { %v960_v0 = vsel %vm710_vm2, %v1469_v61, 0.0 }
 0x293   :  { %961 = vadd.xlane.f32.xlu1 %v960_v0 }
 0x294   :  { %958 = vadd.xlane.f32.xlu0 %v957_v1 }
 0x2e8   :  { %v884_v24 = vpop.xlane.xlu1 %883 }
 0x2e9   :  { %1470 = vlog2.f32 %v884_v24 }
 0x2ec   :  { %v890_v3 = vpop.xlane.xlu1 %889 }
 0x2ed   :  { %1472 = vlog2.f32 %v890_v3  ;;  %v881_v21 = vpop.xlane.xlu0 %880 }
 0x2ee   :  { %1474 = vlog2.f32 %v881_v21 }
 0x2f1   :  { %v887_v7 = vpop.xlane.xlu0 %886 }
 0x2f2   :  { %1476 = vlog2.f32 %v887_v7 }
 0x2f3   :  { %v1471_v26 = vpop.eup %1470 }
 0x2f4   :  { %v966_v9 = vmul.f32 0.6931472, %v1471_v26  ;;  %v896_v31 = vpop.xlane.xlu1 %895 }
 0x2f5   :  { %1478 = vlog2.f32 %v896_v31  ;;  %v893_v12 = vpop.xlane.xlu0 %892 }
 0x2f6   :  { %v1020_v13 = vsub.f32 %v1869_v52, %v966_v9  ;;  %1480 = vlog2.f32 %v893_v12 }
 0x2f7   :  { %v1473_v32 = vpop.eup %1472 }
 0x2f8   :  { %v1475_v37 = vpop.eup %1474  ;;  %1048 = vst.msk [vmem:[%s2153_s5 + $0x8] sm:$0xff] %vm710_vm2, %v1020_v13  ;;  %v970_v19 = vmul.f32 0.6931472, %v1473_v32  ;;  %v902_v60 = vpop.xlane.xlu1 %901 }
 0x2f9   :  { %v964_v22 = vmul.f32 0.6931472, %v1475_v37  ;;  %1482 = vlog2.f32 %v902_v60  ;;  %v899_v23 = vpop.xlane.xlu0 %898 }
 0x2fa   :  { %v1022_v28 = vsub.f32 %v1873_v57, %v970_v19  ;;  %1484 = vlog2.f32 %v899_v23 }
 0x2fb   :  { %v1019_v38 = vsub.f32 %v1876_v58, %v964_v22 }
 0x2fc   :  { %v1477_v30 = vpop.eup %1476  ;;  %1050 = vst.msk [vmem:[%s2153_s5 + $0x18] sm:$0xff] %vm710_vm2, %v1022_v28  ;;  %v908_v52 = vpop.xlane.xlu1 %907 }
 0x2fd   :  { %1047 = vst.msk [vmem:[%s2153_s5] sm:$0xff] %vm710_vm2, %v1019_v38  ;;  %v968_v33 = vmul.f32 0.6931472, %v1477_v30  ;;  %1486 = vlog2.f32 %v908_v52  ;;  %v905_v36 = vpop.xlane.xlu0 %904 }
 0x2fe   :  { %1488 = vlog2.f32 %v905_v36 }
 0x2ff   :  { %v1479_v57 = vpop.eup %1478  ;;  %v1021_v42 = vsub.f32 %v1881_v20, %v968_v33 }
 0x300   :  { %v1481_v58 = vpop.eup %1480  ;;  %v974_v39 = vmul.f32 0.6931472, %v1479_v57  ;;  %v914_v40 = vpop.xlane.xlu1 %913 }
 0x301   :  { %1049 = vst.msk [vmem:[%s2153_s5 + $0x10] sm:$0xff] %vm710_vm2, %v1021_v42  ;;  %v972_v41 = vmul.f32 0.6931472, %v1481_v58  ;;  %1490 = vlog2.f32 %v914_v40  ;;  %v911_v46 = vpop.xlane.xlu0 %910 }
 0x302   :  { %v1024_v47 = vsub.f32 %v1889_v6, %v974_v39  ;;  %1492 = vlog2.f32 %v911_v46 }
 0x303   :  { %v1483_v45 = vpop.eup %1482  ;;  %v1023_v49 = vsub.f32 %v1884_v2, %v972_v41 }
 0x304   :  { %v1485_v51 = vpop.eup %1484  ;;  %1052 = vst.msk [vmem:[%s2153_s5 + $0x28] sm:$0xff] %vm710_vm2, %v1024_v47  ;;  %v978_v20 = vmul.f32 0.6931472, %v1483_v45  ;;  %v920_v53 = vpop.xlane.xlu1 %919 }
 0x305   :  { %1051 = vst.msk [vmem:[%s2153_s5 + $0x20] sm:$0xff] %vm710_vm2, %v1023_v49  ;;  %v976_v18 = vmul.f32 0.6931472, %v1485_v51  ;;  %1494 = vlog2.f32 %v920_v53  ;;  %v917_v6 = vpop.xlane.xlu0 %916 }
 0x306   :  { %v1026_v54 = vsub.f32 %v1898_v14, %v978_v20  ;;  %1496 = vlog2.f32 %v917_v6 }
 0x307   :  { %v1487_v2 = vpop.eup %1486  ;;  %v1025_v50 = vsub.f32 %v1892_v8, %v976_v18 }
 0x308   :  { %v1489_v61 = vpop.eup %1488  ;;  %1054 = vst.msk [vmem:[%s2153_s5 + $0x38] sm:$0xff] %vm710_vm2, %v1026_v54  ;;  %v982_v0 = vmul.f32 0.6931472, %v1487_v2  ;;  %v926_v1 = vpop.xlane.xlu1 %925 }
 0x309   :  { %1053 = vst.msk [vmem:[%s2153_s5 + $0x30] sm:$0xff] %vm710_vm2, %v1025_v50  ;;  %v980_v24 = vmul.f32 0.6931472, %v1489_v61  ;;  %1498 = vlog2.f32 %v926_v1  ;;  %v923_v14 = vpop.xlane.xlu0 %922 }
 0x30a   :  { %v1028_v3 = vsub.f32 %v1907_v29, %v982_v0  ;;  %1500 = vlog2.f32 %v923_v14 }
 0x30b   :  { %v1491_v8 = vpop.eup %1490  ;;  %v1027_v21 = vsub.f32 %v1901_v15, %v980_v24 }
 0x30c   :  { %v1493_v7 = vpop.eup %1492  ;;  %1056 = vst.msk [vmem:[%s2153_s5 + $0x48] sm:$0xff] %vm710_vm2, %v1028_v3  ;;  %v986_v26 = vmul.f32 0.6931472, %v1491_v8  ;;  %v932_v9 = vpop.xlane.xlu1 %931 }
 0x30d   :  { %1055 = vst.msk [vmem:[%s2153_s5 + $0x40] sm:$0xff] %vm710_vm2, %v1027_v21  ;;  %v984_v31 = vmul.f32 0.6931472, %v1493_v7  ;;  %1502 = vlog2.f32 %v932_v9  ;;  %v929_v29 = vpop.xlane.xlu0 %928 }
 0x30e   :  { %v1030_v12 = vsub.f32 %v1917_v44, %v986_v26  ;;  %1504 = vlog2.f32 %v929_v29 }
 0x30f   :  { %v1495_v15 = vpop.eup %1494  ;;  %v1029_v13 = vsub.f32 %v1911_v43, %v984_v31 }
 0x310   :  { %v1497_v32 = vpop.eup %1496  ;;  %1058 = vst.msk [vmem:[%s2153_s5 + $0x58] sm:$0xff] %vm710_vm2, %v1030_v12  ;;  %v990_v37 = vmul.f32 0.6931472, %v1495_v15  ;;  %v938_v19 = vpop.xlane.xlu1 %937 }
 0x311   :  { %1057 = vst.msk [vmem:[%s2153_s5 + $0x50] sm:$0xff] %vm710_vm2, %v1029_v13  ;;  %v988_v60 = vmul.f32 0.6931472, %v1497_v32  ;;  %1506 = vlog2.f32 %v938_v19  ;;  %v935_v44 = vpop.xlane.xlu0 %934 }
 0x312   :  { %v1032_v22 = vsub.f32 %v1926_v59, %v990_v37  ;;  %1508 = vlog2.f32 %v935_v44 }
 0x313   :  { %v1499_v43 = vpop.eup %1498  ;;  %v1031_v23 = vsub.f32 %v1920_v48, %v988_v60 }
 0x314   :  { %v1501_v28 = vpop.eup %1500  ;;  %1060 = vst.msk [vmem:[%s2153_s5 + $0x68] sm:$0xff] %vm710_vm2, %v1032_v22  ;;  %v994_v38 = vmul.f32 0.6931472, %v1499_v43  ;;  %v944_v30 = vpop.xlane.xlu1 %943 }
 0x315   :  { %1059 = vst.msk [vmem:[%s2153_s5 + $0x60] sm:$0xff] %vm710_vm2, %v1031_v23  ;;  %v992_v52 = vmul.f32 0.6931472, %v1501_v28  ;;  %1510 = vlog2.f32 %v944_v30  ;;  %v941_v59 = vpop.xlane.xlu0 %940 }
 0x316   :  { %v1034_v33 = vsub.f32 %v1936_v56, %v994_v38  ;;  %1512 = vlog2.f32 %v941_v59 }
 0x317   :  { %v1503_v48 = vpop.eup %1502  ;;  %v1033_v36 = vsub.f32 %v1930_v55, %v992_v52 }
 0x318   :  { %v1505_v57 = vpop.eup %1504  ;;  %1062 = vst.msk [vmem:[%s2153_s5 + $0x78] sm:$0xff] %vm710_vm2, %v1034_v33  ;;  %v998_v42 = vmul.f32 0.6931472, %v1503_v48  ;;  %v950_v58 = vpop.xlane.xlu1 %949 }
 0x319   :  { %1061 = vst.msk [vmem:[%s2153_s5 + $0x70] sm:$0xff] %vm710_vm2, %v1033_v36  ;;  %v996_v39 = vmul.f32 0.6931472, %v1505_v57  ;;  %1514 = vlog2.f32 %v950_v58  ;;  %v947_v56 = vpop.xlane.xlu0 %946 }
 0x31a   :  { %v1036_v40 = vsub.f32 %v1946_v63, %v998_v42  ;;  %1516 = vlog2.f32 %v947_v56 }
 0x31b   :  { %v1507_v55 = vpop.eup %1506  ;;  %v1035_v41 = vsub.f32 %v1940_v62, %v996_v39 }
 0x31c   :  { %v1509_v46 = vpop.eup %1508  ;;  %1064 = vst.msk [vmem:[%s2153_s5 + $0x88] sm:$0xff] %vm710_vm2, %v1036_v40  ;;  %v1002_v47 = vmul.f32 0.6931472, %v1507_v55  ;;  %v956_v45 = vpop.xlane.xlu1 %955 }
 0x31d   :  { %1063 = vst.msk [vmem:[%s2153_s5 + $0x80] sm:$0xff] %vm710_vm2, %v1035_v41  ;;  %v1000_v49 = vmul.f32 0.6931472, %v1509_v46  ;;  %1518 = vlog2.f32 %v956_v45  ;;  %v953_v63 = vpop.xlane.xlu0 %952 }
 0x31e   :  { %v1038_v51 = vsub.f32 %v1956_v5, %v1002_v47  ;;  %1520 = vlog2.f32 %v953_v63 }
 0x31f   :  { %v1511_v62 = vpop.eup %1510  ;;  %v1037_v20 = vsub.f32 %v1950_v4, %v1000_v49 }
 0x320   :  { %v1513_v53 = vpop.eup %1512  ;;  %1066 = vst.msk [vmem:[%s2153_s5 + $0x98] sm:$0xff] %vm710_vm2, %v1038_v51  ;;  %v1006_v18 = vmul.f32 0.6931472, %v1511_v62  ;;  %v962_v6 = vpop.xlane.xlu1 %961 }
 0x321   :  { %1065 = vst.msk [vmem:[%s2153_s5 + $0x90] sm:$0xff] %vm710_vm2, %v1037_v20  ;;  %v1004_v54 = vmul.f32 0.6931472, %v1513_v53  ;;  %1522 = vlog2.f32 %v962_v6  ;;  %v959_v5 = vpop.xlane.xlu0 %958 }
 0x322   :  { %v1040_v2 = vsub.f32 %v1966_v11, %v1006_v18  ;;  %1524 = vlog2.f32 %v959_v5 }
 0x323   :  { %v1515_v4 = vpop.eup %1514  ;;  %v1039_v50 = vsub.f32 %v1960_v10, %v1004_v54 }
 0x324   :  { %v1517_v61 = vpop.eup %1516  ;;  %1068 = vst.msk [vmem:[%s2153_s5 + $0xa8] sm:$0xff] %vm710_vm2, %v1040_v2  ;;  %v1010_v0 = vmul.f32 0.6931472, %v1515_v4 }
 0x325   :  { %1067 = vst.msk [vmem:[%s2153_s5 + $0xa0] sm:$0xff] %vm710_vm2, %v1039_v50  ;;  %v1008_v1 = vmul.f32 0.6931472, %v1517_v61 }
 0x326   :  { %v1042_v24 = vsub.f32 %v1976_v17, %v1010_v0 }
 0x327   :  { %v1519_v11 = vpop.eup %1518  ;;  %v1041_v14 = vsub.f32 %v1970_v16, %v1008_v1 }
 0x328   :  { %v1521_v3 = vpop.eup %1520  ;;  %1070 = vst.msk [vmem:[%s2153_s5 + $0xb8] sm:$0xff] %vm710_vm2, %v1042_v24  ;;  %v1014_v10 = vmul.f32 0.6931472, %v1519_v11 }
 0x329   :  { %1069 = vst.msk [vmem:[%s2153_s5 + $0xb0] sm:$0xff] %vm710_vm2, %v1041_v14  ;;  %v1012_v8 = vmul.f32 0.6931472, %v1521_v3 }
 0x32a   :  { %v1044_v21 = vsub.f32 %v1986_v27, %v1014_v10 }
 0x32b   :  { %v1523_v7 = vpop.eup %1522  ;;  %v1043_v17 = vsub.f32 %v1980_v25, %v1012_v8 }
 0x32c   :  { %v1525_v26 = vpop.eup %1524  ;;  %1072 = vst.msk [vmem:[%s2153_s5 + $0xc8] sm:$0xff] %vm710_vm2, %v1044_v21  ;;  %v1018_v16 = vmul.f32 0.6931472, %v1523_v7 }
 0x32d   :  { %1071 = vst.msk [vmem:[%s2153_s5 + $0xc0] sm:$0xff] %vm710_vm2, %v1043_v17  ;;  %v1016_v9 = vmul.f32 0.6931472, %v1525_v26 }
 0x32e   :  { %v1046_v31 = vsub.f32 %v1996_v35, %v1018_v16 }
 0x32f   :  { %v1045_v27 = vsub.f32 %v1990_v34, %v1016_v9 }
 0x330   :  { %1074 = vst.msk [vmem:[%s2153_s5 + $0xd8] sm:$0xff] %vm710_vm2, %v1046_v31 }
 0x331   :  { %1073 = vst.msk [vmem:[%s2153_s5 + $0xd0] sm:$0xff] %vm710_vm2, %v1045_v27 }

</bundles_post_ra>
